<compile_context>
chip_gen: v7x
topology: tpu7x:2x2x1
jax: 0.10.0
libtpu: 0.0.40
codegen_flags: <defaults>
</compile_context>

<pallas_src>
import jax
import jax.numpy as jnp
from jax.experimental import pallas as pl
from jax.experimental.pallas import tpu as pltpu

EPS = 1e-5


def _audio_nn_kernel(x_ref, mean_ref, wt_ref, o_ref):
    # x_ref: (tm, D) f32, mean_ref: (1, D) f32, wt_ref: (D, tn) bf16, o_ref: (tm, tn) f32
    h = jnp.maximum(x_ref[...] - mean_ref[...], 0.0)        # BN shift + ReLU (f32 VPU)
    y = jnp.dot(h.astype(jnp.bfloat16), wt_ref[...],        # bf16 MXU, f32 accumulate
                preferred_element_type=jnp.float32)
    o_ref[...] = y.astype(o_ref.dtype)


def _choose_tm(N, cap=512):
    """Row tile: multiple of 8, <= cap, and >= 2 grid steps when possible."""
    if N <= 8 or N % 8 != 0:
        return N                      # single block equal to full array dim
    tm = min(cap, N)
    if tm == N:                       # keep >=2 grid steps for v7x's 2nd TensorCore
        tm = max(8, (N // 2 // 8) * 8)
    return tm


def _choose_tn(OUT, cap=512):
    """Output-column tile: full OUT when small, else a 128-multiple <= cap."""
    if OUT <= cap or OUT % 128 != 0:
        return OUT                    # single block equal to full array dim
    tn = cap
    while OUT % tn != 0:              # cap is a multiple of 128, so this terminates at 128
        tn -= 128
    return tn


def prepare_params(running_mean, running_var, weight, eps=EPS):
    """One-time (model-init) prep: fold BN scale into W^T and cast to bf16."""
    inv_std = jax.lax.rsqrt(running_var + eps)               # (D,)
    wt_scaled = inv_std[:, None] * weight.T                  # (D, OUT) f32
    return running_mean.reshape(1, -1), wt_scaled.astype(jnp.bfloat16)


def audio_nn_forward(x, mean2d, wt_scaled_bf16, *, tm=None, tn=None):
    """x: (N, D) f32; mean2d: (1, D) f32; wt_scaled_bf16: (D, OUT) bf16."""
    N, D = x.shape
    OUT = wt_scaled_bf16.shape[1]
    if tm is None:
        tm = _choose_tm(N)
    if tn is None:
        tn = _choose_tn(OUT)

    grid = (pl.cdiv(N, tm), pl.cdiv(OUT, tn))
    return pl.pallas_call(
        _audio_nn_kernel,
        out_shape=jax.ShapeDtypeStruct((N, OUT), jnp.float32),
        grid_spec=pltpu.PrefetchScalarGridSpec(
            num_scalar_prefetch=0,
            grid=grid,
            in_specs=[
                pl.BlockSpec((tm, D), lambda i, j: (i, 0)),   # x row tile (same across j)
                pl.BlockSpec((1, D), lambda i, j: (0, 0)),    # running mean (resident)
                pl.BlockSpec((D, tn), lambda i, j: (0, j)),   # scaled W^T column tile
            ],
            out_specs=pl.BlockSpec((tm, tn), lambda i, j: (i, j)),
        ),
        compiler_params=pltpu.CompilerParams(
            dimension_semantics=("parallel", "parallel")),
    )(x, mean2d, wt_scaled_bf16)


def audio_nn_reference(x, running_mean, running_var, weight, eps=EPS):
    inv_std = jax.lax.rsqrt(running_var + eps)
    h = (x - running_mean[None, :]) * inv_std[None, :]
    h = jnp.maximum(h, 0.0)
    return h @ weight.T


if __name__ == "__main__":
    input_dim = 128
    output_dim = 128
    batch = 64            # multiple of 8 -> tm=32, 2 row-grid steps (megacore-friendly)

    key = jax.random.PRNGKey(0)
    k_x, k_w, k_m, k_v = jax.random.split(key, 4)

    x = jax.random.normal(k_x, (batch, input_dim), dtype=jnp.float32)

    # nn.Linear default init: U(-1/sqrt(fan_in), 1/sqrt(fan_in)), bias=False
    bound = 1.0 / (input_dim ** 0.5)
    weight = jax.random.uniform(
        k_w, (output_dim, input_dim), dtype=jnp.float32,
        minval=-bound, maxval=bound)

    # Deterministic, non-trivial running stats for BatchNorm1d (affine=False)
    running_mean = 0.1 * jax.random.normal(k_m, (input_dim,), dtype=jnp.float32)
    running_var = 1.0 + 0.1 * jax.random.uniform(k_v, (input_dim,),
                                                 dtype=jnp.float32)

    mean2d, wt_scaled_bf16 = prepare_params(running_mean, running_var, weight)

    out = audio_nn_forward(x, mean2d, wt_scaled_bf16)
    out = jax.block_until_ready(out)

    ref = audio_nn_reference(x, running_mean, running_var, weight)
    assert out.shape == (batch, output_dim)
    # bf16 MXU inputs (f32 accumulation) -> tolerance loosened vs pure-f32 ref.
    assert jnp.allclose(out, ref, atol=2e-2, rtol=2e-2), "mismatch vs reference"

    print("KERNEL_OK")
</pallas_src>

<mosaic_0001>
module attributes {stable_mosaic.version = 11 : i64} {
  func.func @_audio_nn_kernel(%arg0: i32, %arg1: i32, %arg2: memref<32x128xf32, #tpu.memory_space<vmem>>, %arg3: memref<1x128xf32, #tpu.memory_space<vmem>>, %arg4: memref<128x128xbf16, #tpu.memory_space<vmem>>, %arg5: memref<32x128xf32, #tpu.memory_space<vmem>>) attributes {dimension_semantics = [#tpu.dimension_semantics<parallel>, #tpu.dimension_semantics<parallel>], iteration_bounds = array<i64: 2, 1>, scalar_prefetch = 0 : i64, scratch_operands = 0 : i64, tpu.core_type = #tpu.core_type<tc>, window_params = [{transform_indices = @transform_0, window_bounds = array<i64: 32, 128>}, {pipeline_mode = #tpu.pipeline_mode<synchronous>, transform_indices = @transform_1, window_bounds = array<i64: 1, 128>}, {transform_indices = @transform_2, window_bounds = array<i64: 128, 128>}, {transform_indices = @transform_3, window_bounds = array<i64: 32, 128>}]} {
    %c0 = arith.constant 0 : index
    %c0_0 = arith.constant 0 : index
    %0 = vector.load %arg2[%c0, %c0_0] : memref<32x128xf32, #tpu.memory_space<vmem>>, vector<32x128xf32>
    %c0_1 = arith.constant 0 : index
    %c0_2 = arith.constant 0 : index
    %1 = vector.load %arg3[%c0_1, %c0_2] : memref<1x128xf32, #tpu.memory_space<vmem>>, vector<1x128xf32>
    %2 = vector.broadcast %1 : vector<1x128xf32> to vector<32x128xf32>
    %3 = arith.subf %0, %2 : vector<32x128xf32>
    %cst = arith.constant 0.000000e+00 : f32
    %4 = vector.broadcast %cst : f32 to vector<32x128xf32>
    %5 = arith.maximumf %3, %4 : vector<32x128xf32>
    %6 = arith.truncf %5 : vector<32x128xf32> to vector<32x128xbf16>
    %c0_3 = arith.constant 0 : index
    %c0_4 = arith.constant 0 : index
    %7 = vector.load %arg4[%c0_3, %c0_4] : memref<128x128xbf16, #tpu.memory_space<vmem>>, vector<128x128xbf16>
    %cst_5 = arith.constant dense<0.000000e+00> : vector<32x128xf32>
    %8 = tpu.matmul %6, %7, %cst_5 {dimension_numbers = #tpu.dot_dimension_numbers<[1], [0], [0], [1], [0, 0, 1, 1], [], []>} : vector<32x128xbf16>, vector<128x128xbf16>, vector<32x128xf32> -> vector<32x128xf32>
    %c0_6 = arith.constant 0 : index
    %c0_7 = arith.constant 0 : index
    %9 = vector.load %arg5[%c0_6, %c0_7] : memref<32x128xf32, #tpu.memory_space<vmem>>, vector<32x128xf32>
    tpu.vector_store %arg5[%c0_6, %c0_7], %8 {strides = array<i32>} : memref<32x128xf32, #tpu.memory_space<vmem>>, vector<32x128xf32>,
    return
  }
  func.func @transform_0(%arg0: i32, %arg1: i32) -> (i32, i32) {
    %c0_i32 = arith.constant 0 : i32
    %c0_i32_0 = arith.constant 0 : i32
    return %arg0, %c0_i32 : i32, i32
  }
  func.func @transform_1(%arg0: i32, %arg1: i32) -> (i32, i32) {
    %c0_i32 = arith.constant 0 : i32
    %c0_i32_0 = arith.constant 0 : i32
    %c0_i32_1 = arith.constant 0 : i32
    return %c0_i32, %c0_i32_0 : i32, i32
  }
  func.func @transform_2(%arg0: i32, %arg1: i32) -> (i32, i32) {
    %c0_i32 = arith.constant 0 : i32
    %c0_i32_0 = arith.constant 0 : i32
    return %c0_i32, %arg1 : i32, i32
  }
  func.func @transform_3(%arg0: i32, %arg1: i32) -> (i32, i32) {
    %c0_i32 = arith.constant 0 : i32
    return %arg0, %arg1 : i32, i32
  }
}

</mosaic_0001>

<bundles_post_ra>
// kernel: tpu_custom_call.1
= control target key start
LH: loop header
LB: loop body
LE: loop exit
PB: predicated region body
PF: predicated region fallthrough
CT: control target
= control target key end

     0   :  { %8 = vsyncpa [#allocation3], 0  ;;  %s1028_s0 = inlined_call_operand.hbm [shape: f32[64,128], index: 0, kind: input, shape index: {}]   ;;  %s1029_s1 = inlined_call_operand.vmem [shape: f32[1,128], index: 1, kind: input, shape index: {}]   ;;  %s1030_s2 = inlined_call_operand.hbm [shape: bf16[128,128], index: 2, kind: input, shape index: {}]   ;;  %s1031_s3 = inlined_call_operand.hbm [shape: f32[64,128], index: 3, kind: output, shape index: {}]  }
   0x1   :  { %10 = vsyncpa [#allocation3 + $0x1], 0 }
   0x2   :  { %11 = vsyncpa [#allocation6], 0 }
   0x3   :  { %12 = vsyncpa [#allocation4], 0 }
   0x4   :  { %14 = vsyncpa [#allocation4 + $0x1], 0  ;;  %s796_s12 = smov 0   ;;  %s798_s13 = smov 0  }
   0x5   :  { %s800_s14 = smov 0   ;;  %s802_s15 = smov 0  }
   0x6   :  { %s804_s16 = smov 0   ;;  %s806_s17 = smov 0  }
   0x7 LB: > { %s476_s18 = sadd.s32 4294967295, %s765_s17   ;;  %s477_s19 = sadd.s32 4294967294, %s765_s17   ;;  %s765_s17 = sphi %s806_s17, %s20_s17   ;;  %s761_s16 = sphi %s804_s16, %s1055_s16   ;;  %s757_s15 = sphi %s802_s15, %s1054_s15   ;;  %s753_s14 = sphi %s800_s14, %s1053_s14   ;;  %s749_s13 = sphi %s798_s13, %s1052_s13   ;;  %s745_s12 = sphi %s796_s12, %s1051_s12  }
   0x8   : > { %p52_p0 = scmp.ne.s32.totalorder %s749_s13, %s745_s12  ;;  %p830_p1 = scmp.eq.s32.totalorder %s476_s18, 0 }
   0x9   : > { %p834_p2 = scmp.eq.s32.totalorder %s476_s18, 1  ;;  %p131_p3 = scmp.eq.s32.totalorder %s477_s19, 1 }
   0xa   : > { %s1036_s20 = scalar_select %p830_p1, 1, 0 }
   0xb   : > { %s1037_s21 = scalar_select %p834_p2, 1, 0 }
   0xc   : > { %p840_p4 = por %p830_p1, %p52_p0  ;;  %p478_p5 = scmp.ge.s32.totalorder %s765_s17, 1 }
   0xd   : > { %p845_p6 = por %p131_p3, %p52_p0  ;;  %p138_p7 = scmp.lt.s32.totalorder %s765_s17, 3 }
   0xe   : > { %s1038_s22 = scalar_select %p840_p4, 1, 0 }
   0xf   : > { %s1039_s23 = scalar_select %p845_p6, 1, 0 }
  0x10   : > { %p850_p8 = pnand %p478_p5, %p138_p7  ;;  %s767_s25 = smov [#allocation5]  }
  0x11   : > { %s155_s26 = sshll.u32 %s767_s25, 4  ;;  %s32_s28 = sadd.s32 1, %s761_s16  ;;  %s156_s26 = int_to_ptr.vmem [resolvable:$true] %s155_s26 }
  0x12   : > { %s1040_s24 = scalar_select %p850_p8, 1, 0 }
  0x13   : > { %p542_p9 = pneg %p850_p8  ;;  %s621_s4 = scalar_lea.hbm %s1030_s2, 1024 }
  0x14   : > { %p622_p12 = scmp.ne.s32.totalorder %s1030_s2, %s621_s4  ;;  %p628_p5 = scmp.lt.u32.totalorder %s621_s4, %s1030_s2 }
  0x15   : > { %p859_p11 = pnand %p542_p9, %p830_p1 }
  0x17   : > { %p623_p13 = pneg %p859_p11 }
  0x19   : > { %p624_p0 = pnand %p623_p13, %p622_p12 }
  0x1b   : > { %p625_p3 = pneg %p624_p0 }
  0x1d   : > { %p630_p7 = pnand %p628_p5, %p625_p3 }
  0x1f   : > { %633 = shalt.err (!%p630_p7)
}
  0x20   : > { %s634_s9 = scalar_lea.vmem %s156_s26, 1024  ;;  %p642_p1 = scmp.lt.s32.totalorder %s156_s26, %s156_s26 }
  0x21   : > { %p635_p9 = scmp.ne.s32.totalorder %s156_s26, %s634_s9  ;;  %p643_p4 = scmp.lt.s32.totalorder %s634_s9, %s634_s9 }
  0x23   : > { %p637_p10 = pnand %p635_p9, %p623_p13  ;;  %p644_p8 = por %p643_p4, %p642_p1 }
  0x25   : > { %p638_p6 = pneg %p637_p10 }
  0x27   : > { %p645_p2 = pnand %p644_p8, %p638_p6 }
  0x29   : > { %648 = shalt.err (!%p645_p2)
}
  0x2a   : > { %s768_s10 = smov 64   ;;  %s769_s11 = smov 4  }
  0x2b   : > { %545 = dma.hbm_to_vmem [thread:$0]  (!%p859_p11), %s1030_s2, 1024, %s156_s26, [#allocation6], %s768_s10, %s768_s10, %s769_s11  }
  0x2c   : > { %p34_p1 = scmp.ge.s32.totalorder %s32_s28, 2  ;;  %s39_s25 = sadd.s32 1, %s753_s14 }
  0x2d   : > { %p46_p2 = scmp.ne.s32.totalorder %s753_s14, %s749_s13  ;;  %p47_p4 = scmp.eq.s32.totalorder %s765_s17, 0 }
  0x2e   : > { %s1057_s28 = smov (%p34_p1, %s32_s28), 0  ;;  %p1043_p8 = scmp.ne.s32.totalorder %s1037_s21, 0 }
  0x2f   : > { %p886_p6 = por %p47_p4, %p46_p2  ;;  %s36_s27 = ssub.s32 %s761_s16, %s1057_s28 }
  0x30   : > { %p892_p10 = por %p1043_p8, %p46_p2  ;;  %p555_p12 = scmp.lt.s32.totalorder %s765_s17, 2 }
  0x31   : > { %p37_p11 = scmp.eq.s32.totalorder %s36_s27, 0  ;;  %s169_s26 = sand.u32 1, %s753_s14  }
  0x32   : > { %s481_s4 = sshll.u32 %s169_s26, 5  ;;  %s502_s6 = sshll.u32 %s761_s16, 9 }
  0x33   : > { %s901_s5 = scalar_select %p37_p11, %s753_s14, %s39_s25  }
  0x34   : > { %s907_s9 = scalar_lea.hbm %s1028_s0, %s502_s6  ;;  %s173_s21 = scalar_lea.vmem [#allocation2], %s481_s4 }
  0x35   : > { %s180_s10 = sshll.u32 %s173_s21, 4  ;;  %p913_p13 = pnand %p555_p12, %p886_p6  ;;  %s909_s10 = int_to_ptr.vmem [resolvable:$true] %s180_s10 }
  0x36   : > { %s917_s18 = scalar_lea.sflag [#allocation3], %s169_s26  ;;  %s649_s19 = scalar_lea.hbm %s907_s9, 512 }
  0x37   : > { %p650_p0 = scmp.ne.s32.totalorder %s907_s9, %s649_s19  ;;  %p651_p3 = pneg %p913_p13 }
  0x38   : > { %s654_s29 = scalar_lea.hbm %s1028_s0, 1024  ;;  %p655_p9 = scmp.lt.u32.totalorder %s907_s9, %s1028_s0 }
  0x39   : > { %p652_p5 = pnand %p651_p3, %p650_p0  ;;  %p656_p1 = scmp.lt.u32.totalorder %s654_s29, %s649_s19 }
  0x3a   : > { %p658_p4 = scmp.lt.u32.totalorder %s649_s19, %s907_s9 }
  0x3b   : > { %p653_p7 = pneg %p652_p5  ;;  %p657_p2 = por %p656_p1, %p655_p9 }
  0x3d   : > { %p659_p6 = por %p658_p4, %p657_p2 }
  0x3f   : > { %p660_p8 = pnand %p659_p6, %p653_p7 }
  0x41   : > { %663 = shalt.err (!%p660_p8)
}
  0x42   : > { %s664_s26 = scalar_lea.vmem %s909_s10, 512  ;;  %s770_s7 = smov [#allocation2]  }
  0x43   : > { %p665_p12 = scmp.ne.s32.totalorder %s909_s10, %s664_s26  ;;  %s669_s8 = sshll.u32 %s770_s7, 4  ;;  %s670_s8 = int_to_ptr.vmem [resolvable:$false] %s669_s8 }
  0x44   : > { %s671_s21 = scalar_lea.vmem %s670_s8, 1024  ;;  %p672_p5 = scmp.lt.s32.totalorder %s909_s10, %s670_s8 }
  0x45   : > { %p667_p11 = pnand %p665_p12, %p651_p3  ;;  %p673_p9 = scmp.lt.s32.totalorder %s671_s21, %s664_s26 }
  0x47   : > { %p668_p0 = pneg %p667_p11  ;;  %p674_p1 = por %p673_p9, %p672_p5 }
  0x49   : > { %p675_p2 = pnand %p674_p1, %p668_p0 }
  0x4b   : > { %678 = shalt.err (!%p675_p2)
}
  0x4c   : > { %s771_s19 = smov 128   ;;  %s772_s25 = smov 8  }
  0x4d   : > { %549 = dma.hbm_to_vmem [thread:$0]  (!%p913_p13), %s907_s9, 512, %s909_s10, %s917_s18, %s771_s19, %s771_s19, %s772_s25  }
  0x4e   : > { %p1046_p3 = scmp.ne.s32.totalorder %s1040_s24, 0 }
  0x4f   : > { %s948_s27 = sand.u32 (!%p1046_p3), 1, %s749_s13   ;;  %p1047_p7 = scmp.ne.s32.totalorder (!%p1046_p3), %s1038_s22, 0 }
  0x50   : > { %192 = sbr.rel (%p1046_p3) target bundleno = 354 (0x162), region = 32  ;;  %s485_s29 = sshll.u32 (!%p1046_p3), %s948_s27, 5 }
  0x51   : > { %s195_s4 = scalar_lea.sflag (!%p1046_p3), [#allocation3], %s948_s27  ;;  %s954_s6 = scalar_lea.vmem (!%p1046_p3), [#allocation2], %s485_s29 }
  0x57   : > { %732 = dma.done.wait (%p1047_p7), %s195_s4, 512  }
  0x58   : > { %734 = vsyncadd (%p1047_p7), %s195_s4, 4294966784  ;;  %p1048_p13 = scmp.ne.s32.totalorder %s1036_s20, 0 }
  0x5a   : > { %736 = dma.done.wait (%p1048_p13), [#allocation6], 1024  }
  0x5b   : > { %738 = vsyncadd (%p1048_p13), [#allocation6], 4294966272  ;;  %v613_v0 = vld [vmem:[#allocation5] sm:$0xff]   ;;  %v614_v1 = vld [vmem:[#allocation5 + $0x8] sm:$0xff]   ;;  %s224_s20 = scalar_lea.vmem [#allocation7], %s485_s29  ;;  %s503_s10 = sshll.u32 %s757_s15, 9 }
  0x5c   : > { %514 = vmatprep.subr.bf16.mxu0 %v613_v0  ;;  %v615_v2 = vld [vmem:[#allocation5 + $0x10] sm:$0xff]   ;;  %v616_v3 = vld [vmem:[#allocation5 + $0x18] sm:$0xff]   ;;  %v228_v4 = vld [vmem:[%s954_s6] sm:$0xff]  ;;  %s381_s9 = sshll.u32 %s224_s20, 4  ;;  %s979_s26 = scalar_lea.hbm %s1031_s3, %s503_s10  ;;  %s974_s9 = int_to_ptr.vmem [resolvable:$true] %s381_s9 }
  0x5d   : > { %515 = vmatpush3.bf16.msra.mxu0 %v613_v0  ;;  %v229_v5 = vld [vmem:[%s954_s6 + $0x8] sm:$0xff]  ;;  %v488_v6 = vld [vmem:[%s1029_s1] ss:$0 sm:$0xff]  ;;  %v230_v14 = vld [vmem:[%s954_s6 + $0x10] sm:$0xff]  ;;  %s367_s7 = scalar_lea.sflag [#allocation4], %s948_s27  ;;  %s679_s15 = scalar_lea.vmem %s974_s9, 512 }
  0x5e   : > { %516 = vmatprep.subr.bf16.mxu0 %v614_v1  ;;  %v239_v7 = vsub.f32 %v228_v4, %v488_v6  ;;  %v240_v8 = vsub.f32 %v229_v5, %v488_v6  ;;  %v617_v11 = vld [vmem:[#allocation5 + $0x20] sm:$0xff]   ;;  %v618_v13 = vld [vmem:[#allocation5 + $0x28] sm:$0xff]   ;;  %v231_v15 = vld [vmem:[%s954_s6 + $0x18] sm:$0xff]  ;;  %v241_v17 = vsub.f32 %v230_v14, %v488_v6  ;;  %p680_p4 = scmp.ne.s32.totalorder %s974_s9, %s679_s15  ;;  %s773_s8 = smov [#allocation7]  }
  0x5f   : > { %v619_v16 = vld [vmem:[#allocation5 + $0x30] sm:$0xff]   ;;  %v242_v18 = vsub.f32 %v231_v15, %v488_v6  ;;  %v620_v19 = vld [vmem:[#allocation5 + $0x38] sm:$0xff]   ;;  %s683_s21 = sshll.u32 %s773_s8, 4  ;;  %s684_s21 = int_to_ptr.vmem [resolvable:$false] %s683_s21 }
  0x60   : > { %v243_v9 = vmax.f32 %v239_v7, 0.0  ;;  %v244_v10 = vmax.f32 %v240_v8, 0.0  ;;  %v245_v20 = vmax.f32 %v241_v17, 0.0  ;;  %p681_p6 = pnand %p680_p4, %p892_p10  ;;  %s685_s19 = scalar_lea.vmem %s684_s21, 1024 }
  0x61   : > { %517 = vmatpush3.bf16.msra.mxu0 %v614_v1  ;;  %v246_v21 = vmax.f32 %v242_v18, 0.0  ;;  %p686_p12 = scmp.lt.s32.totalorder %s974_s9, %s684_s21  ;;  %p687_p11 = scmp.lt.s32.totalorder %s685_s19, %s679_s15 }
  0x62   : > { %518 = vmatprep.subr.bf16.mxu0 %v615_v2  ;;  %v247_v12 = vpack.c.bf16 %v244_v10, %v243_v9  ;;  %p682_p8 = pneg %p681_p6 }
  0x63   : > { %v248_v22 = vpack.c.bf16 %v246_v21, %v245_v20  ;;  %p688_p0 = por %p687_p11, %p686_p12 }
  0x64   : > { %530 = vmatprep.mubr.bf16.mxu0 %v247_v12 }
  0x65   : > { %519 = vmatpush3.bf16.msra.mxu0 %v615_v2  ;;  %p689_p5 = pnand %p688_p0, %p682_p8 }
  0x66   : > { %520 = vmatprep.subr.bf16.mxu0 %v616_v3 }
  0x69   : > { %521 = vmatpush3.bf16.msra.mxu0 %v616_v3 }
  0x6a   : > { %522 = vmatprep.subr.bf16.mxu0 %v617_v11 }
  0x6d   : > { %523 = vmatpush3.bf16.msra.mxu0 %v617_v11 }
  0x6e   : > { %524 = vmatprep.subr.bf16.mxu0 %v618_v13 }
  0x71   : > { %525 = vmatpush3.bf16.msra.mxu0 %v618_v13 }
  0x72   : > { %526 = vmatprep.subr.bf16.mxu0 %v619_v16 }
  0x75   : > { %527 = vmatpush3.bf16.msra.mxu0 %v619_v16 }
  0x76   : > { %528 = vmatprep.subr.bf16.mxu0 %v620_v19 }
  0x79   : > { %529 = vmatpush3.bf16.msra.mxu0 %v620_v19 }
  0x7c   : > { %531 = vmatmul.mubr.bf16.vlgmr.msra.gmra.mrb[0].mxu0 %v248_v22 }
 0x14f   : > { %v532_v23 = vpop.f32.mrb[0].mxu0 }
 0x150   : > { %364 = vst [vmem:[%s224_s20 + $0x10] sm:$0xff] %v532_v23  ;;  %v347_v24 = vpop.f32.mrb[1].mxu0 }
 0x151   : > { %362 = vst [vmem:[%s224_s20] sm:$0xff] %v347_v24  ;;  %v533_v25 = vpop.f32.mrb[2].mxu0 }
 0x152   : > { %365 = vst [vmem:[%s224_s20 + $0x18] sm:$0xff] %v533_v25  ;;  %v350_v26 = vpop.f32.mrb[3].mxu0 }
 0x153   : > { %363 = vst [vmem:[%s224_s20 + $0x8] sm:$0xff] %v350_v26 }
 0x154   : > { %692 = shalt.err (!%p689_p5)
}
 0x155   : > { %s693_s25 = scalar_lea.hbm %s979_s26, 512  ;;  %s697_s6 = scalar_lea.hbm %s1031_s3, 1024 }
 0x156   : > { %p694_p9 = scmp.ne.s32.totalorder %s979_s26, %s693_s25  ;;  %p698_p3 = scmp.lt.u32.totalorder %s979_s26, %s1031_s3 }
 0x157   : > { %p699_p7 = scmp.lt.u32.totalorder %s697_s6, %s693_s25  ;;  %p701_p4 = scmp.lt.u32.totalorder %s693_s25, %s979_s26 }
 0x158   : > { %p695_p1 = pnand %p694_p9, %p892_p10 }
 0x159   : > { %p700_p13 = por %p699_p7, %p698_p3 }
 0x15a   : > { %p696_p2 = pneg %p695_p1 }
 0x15b   : > { %p702_p6 = por %p701_p4, %p700_p13 }
 0x15d   : > { %p703_p8 = pnand %p702_p6, %p696_p2 }
 0x15f   : > { %706 = shalt.err (!%p703_p8)
}
 0x160   : > { %s774_s20 = smov 128   ;;  %s775_s10 = smov 8  }
 0x161   : > { %540 = dma.vmem_to_hbm [thread:$0]  (%p892_p10), %s974_s9, 512, %s979_s26, %s367_s7, %s774_s20, %s774_s20, %s775_s10  }
 0x162 PF: > { %s396_s11 = sand.u32 1, %s745_s12   ;;  %p1049_p12 = scmp.ne.s32.totalorder %s1039_s23, 0 }
 0x163   : > { %p1050_p11 = scmp.ge.s32.totalorder %s765_s17, 2  ;;  %s397_s18 = scalar_lea.sflag [#allocation4], %s396_s11 }
 0x165   : > { %p551_p0 = pnand %p1050_p11, %p1049_p12 }
 0x167   : > { %740 = dma.done.wait (!%p551_p0), %s397_s18, 512  }
 0x168   : > { %742 = vsyncadd (!%p551_p0), %s397_s18, 4294966784  ;;  %s20_s17 = sadd.s32 1, %s765_s17   ;;  %s1051_s12 = smov %s749_s13 }
 0x169   : > { %p17_p5 = scmp.ge.s32.totalorder %s20_s17, 4   ;;  %s1052_s13 = smov %s753_s14 }
 0x16a   : > { %s1053_s14 = smov %s901_s5  ;;  %s1054_s15 = smov %s761_s16 }
 0x16b   : > { %s1055_s16 = smov %s1057_s28  ;;  %19 = sbr.rel (!%p17_p5) target bundleno = 7 (0x7), region = 82 }
 0x172   :  { %402 = vsyncpa [#allocation3], 1 }
 0x173   :  { %404 = vsyncpa [#allocation3 + $0x1], 1 }
 0x174   :  { %405 = vsyncpa [#allocation6], 1 }
 0x175   :  { %406 = vsyncpa [#allocation4], 1 }
 0x176   :  { %408 = vsyncpa [#allocation4 + $0x1], 1 }

</bundles_post_ra>
